<compile_context>
chip_gen: v7x
topology: tpu7x:2x2x1
jax: 0.10.0
libtpu: 0.0.40
codegen_flags: <defaults>
</compile_context>

<pallas_src>
import functools

import numpy as np

import jax
import jax.numpy as jnp
from jax import lax
from jax.experimental import pallas as pl
from jax.experimental.pallas import tpu as pltpu  # noqa: F401  (see TODOs above)


# ----------------------------- fused Pallas kernel ---------------------------

def _dddd_block_kernel(x_ref, m_ref, w1_ref, t1_ref, w2_ref, s2_ref, t2_ref,
                       w3_ref, t3_ref, o_ref, *, P, cin, cout, W2s, d):
    """Whole batch per invocation.  Layout: channels on sublanes, flattened
    (n, h2, w2) on lanes (L = N*H2*W2)."""
    X = x_ref[...]                       # (P, Cin, L)   P = 4 pool parities (1 if stride==1)
    W1 = w1_ref[...]                     # (Cout, Cin)   bn1-folded 1x1 weights
    t1 = t1_ref[...]                     # (Cout, 1)

    # conv1 (1x1) + bn1 + relu, fused with the 2x2 average pool: the wrapper
    # delivers the four pooling-parity sub-images, so pool == mean over them.
    pooled = None
    for p in range(P):
        acc = None
        for ci in range(cin):
            term = W1[:, ci:ci + 1] * X[p, ci][None, :]          # (Cout, L)
            acc = term if acc is None else acc + term
        yp = jnp.maximum(acc + t1, 0.0)
        pooled = yp if pooled is None else pooled + yp
    pooled = pooled * (1.0 / P)                                   # (Cout, L)

    # Depthwise dilated 3x3 + residual, folded bn2, relu -- on the flattened
    # slab: each tap is a uniform static lane roll shared by all channels, and
    # the host-precomputed 0/1 mask row m_ref[k] implements the zero padding.
    Wd = w2_ref[...]                     # (Cout, 9)  bn2-scaled depthwise taps
    s2 = s2_ref[...]                     # (Cout, 1)
    t2 = t2_ref[...]                     # (Cout, 1)
    acc2 = pooled * s2 + t2              # residual path through bn2
    for kh in range(3):
        for kw in range(3):
            k = kh * 3 + kw
            off = (kh - 1) * d * W2s + (kw - 1) * d
            shifted = pooled if off == 0 else jnp.roll(pooled, -off, axis=1)
            acc2 = acc2 + (shifted * m_ref[k][None, :]) * Wd[:, k:k + 1]
    z = jnp.maximum(acc2, 0.0)                                    # (Cout, L)

    # conv3 (1x1) + folded bn3 + relu; one lane-dense store of the whole slab.
    W3 = w3_ref[...]                     # (Cout, Cout)
    t3 = t3_ref[...]                     # (Cout, 1)
    acc3 = None
    for ci in range(cout):
        term = W3[:, ci:ci + 1] * z[ci][None, :]
        acc3 = term if acc3 is None else acc3 + term
    o_ref[...] = jnp.maximum(acc3 + t3, 0.0)


# ----------------------------- forward wrapper -------------------------------

def ddddblock_forward(x_nchw, p, *, dilation, stride, eps=1e-5):
    N, Cin, H, W = x_nchw.shape
    Cout = p['w1'].shape[0]
    d = int(dilation)

    # Fold inference-mode BatchNorm + conv bias into per-channel scale/shift.
    def fold(i, bias):
        s = p[f'bn{i}_gamma'] / jnp.sqrt(p[f'bn{i}_var'] + eps)
        t = bias * s + p[f'bn{i}_beta'] - p[f'bn{i}_mean'] * s
        return s, t

    s1, t1 = fold(1, p['b1'])
    s2, t2 = fold(2, p['b2'])
    s3, t3 = fold(3, p['b3'])
    w1f = (p['w1'][:, :, 0, 0] * s1[:, None]).astype(jnp.float32)         # (Cout, Cin)
    w2f = (p['w2'][:, 0] * s2[:, None, None]).reshape(Cout, 9).astype(jnp.float32)
    w3f = (p['w3'][:, :, 0, 0] * s3[:, None]).astype(jnp.float32)         # (Cout, Cout)

    x = x_nchw.astype(jnp.float32)
    if stride == 2:
        # TODO(synk): AvgPool2d ceil_mode partial windows (odd H/W) unhandled.
        assert H % 2 == 0 and W % 2 == 0, "odd spatial dims not supported"
        H2, W2 = H // 2, W // 2
        P = 4
        # Four 2x2-pooling parity sub-images, spatial+batch flattened on lanes.
        xp = x.reshape(N, Cin, H2, 2, W2, 2).transpose(3, 5, 1, 0, 2, 4)
        x_packed = xp.reshape(P, Cin, N * H2 * W2)
    else:
        H2, W2 = H, W
        P = 1
        x_packed = x.transpose(1, 0, 2, 3).reshape(1, Cin, N * H2 * W2)

    L = N * H2 * W2

    # Host-precomputed border masks for the 9 dilated taps (shape-only
    # constants -- never rebuilt inside the kernel).
    ls = np.arange(L)
    h2c = (ls // W2) % H2
    w2c = ls % W2
    masks = np.zeros((9, L), np.float32)
    for kh in range(3):
        for kw in range(3):
            dh, dw = (kh - 1) * d, (kw - 1) * d
            ok = ((h2c + dh >= 0) & (h2c + dh < H2) &
                  (w2c + dw >= 0) & (w2c + dw < W2))
            masks[kh * 3 + kw] = ok.astype(np.float32)
    masks = jnp.asarray(masks)

    col = lambda v: v.reshape(Cout, 1).astype(jnp.float32)
    kern = functools.partial(_dddd_block_kernel, P=P, cin=Cin, cout=Cout,
                             W2s=W2, d=d)

    # Gridless pallas_call: every (tiny) operand lives whole in VMEM, the
    # output is a single lane-dense (Cout, N*H2*W2) slab.
    out = pl.pallas_call(
        kern,
        out_shape=jax.ShapeDtypeStruct((Cout, L), jnp.float32),
    )(x_packed, masks,
      w1f, col(t1),
      w2f, col(s2), col(t2),
      w3f, col(t3))

    # Back to NCHW for the caller.
    return out.reshape(Cout, N, H2, W2).transpose(1, 0, 2, 3)


# ----------------------------- parameters ------------------------------------

def init_params(key, in_channels, out_channels):
    ks = jax.random.split(key, 9)
    p = {}
    p['w1'] = 0.1 * jax.random.normal(ks[0], (out_channels, in_channels, 1, 1))
    p['b1'] = 0.1 * jax.random.normal(ks[1], (out_channels,))
    p['w2'] = 0.1 * jax.random.normal(ks[2], (out_channels, 1, 3, 3))
    p['b2'] = 0.1 * jax.random.normal(ks[3], (out_channels,))
    p['w3'] = 0.1 * jax.random.normal(ks[4], (out_channels, out_channels, 1, 1))
    p['b3'] = 0.1 * jax.random.normal(ks[5], (out_channels,))
    for i, k in zip((1, 2, 3), (ks[6], ks[7], ks[8])):
        kg, kb, km, kv = jax.random.split(k, 4)
        p[f'bn{i}_gamma'] = 1.0 + 0.1 * jax.random.normal(kg, (out_channels,))
        p[f'bn{i}_beta'] = 0.1 * jax.random.normal(kb, (out_channels,))
        p[f'bn{i}_mean'] = 0.1 * jax.random.normal(km, (out_channels,))
        p[f'bn{i}_var'] = jnp.abs(1.0 + 0.1 * jax.random.normal(kv, (out_channels,)))
    return jax.tree.map(lambda a: a.astype(jnp.float32), p)


# ----------------------------- pure-JAX reference ----------------------------

def reference_forward(x, p, *, dilation, stride, eps=1e-5):
    def bn(y, i):
        g = p[f'bn{i}_gamma'][None, :, None, None]
        b = p[f'bn{i}_beta'][None, :, None, None]
        m = p[f'bn{i}_mean'][None, :, None, None]
        v = p[f'bn{i}_var'][None, :, None, None]
        return (y - m) / jnp.sqrt(v + eps) * g + b

    Cout = p['w1'].shape[0]
    y = lax.conv_general_dilated(x, p['w1'], (1, 1), 'VALID')
    y = y + p['b1'][None, :, None, None]
    y = jax.nn.relu(bn(y, 1))
    if stride == 2:
        N, C, H, W = y.shape
        y = y.reshape(N, C, H // 2, 2, W // 2, 2).mean(axis=(3, 5))
    d = dilation
    y2 = lax.conv_general_dilated(y, p['w2'], (1, 1), [(d, d), (d, d)],
                                  rhs_dilation=(d, d),
                                  feature_group_count=Cout)
    y = y2 + p['b2'][None, :, None, None] + y
    y = jax.nn.relu(bn(y, 2))
    y = lax.conv_general_dilated(y, p['w3'], (1, 1), 'VALID')
    y = y + p['b3'][None, :, None, None]
    y = jax.nn.relu(bn(y, 3))
    return y


# ----------------------------- main -------------------------------------------

if __name__ == "__main__":
    key = jax.random.PRNGKey(0)
    kx, kp = jax.random.split(key)

    in_channels, out_channels = 4, 8
    dilations = (2, 2)
    # Note: the PyTorch module computes groups = out_channels // group_width but
    # never uses it in any conv (conv1/conv3 are dense, conv2 is per-channel).
    group_width = 4
    stride = 2

    x = jax.random.normal(kx, (2, in_channels, 16, 16), jnp.float32)
    params = init_params(kp, in_channels, out_channels)

    out = ddddblock_forward(x, params, dilation=dilations[0], stride=stride)
    out = jax.block_until_ready(out)

    ref = reference_forward(x, params, dilation=dilations[0], stride=stride)
    assert out.shape == ref.shape, (out.shape, ref.shape)
    max_err = float(jnp.max(jnp.abs(out - ref)))
    assert jnp.allclose(out, ref, atol=1e-4, rtol=1e-4), max_err

    print("KERNEL_OK")
</pallas_src>

<mosaic_0001>
module attributes {stable_mosaic.version = 11 : i64} {
  func.func @_dddd_block_kernel(%arg0: memref<4x4x128xf32, #tpu.memory_space<vmem>>, %arg1: memref<9x128xf32, #tpu.memory_space<vmem>>, %arg2: memref<8x4xf32, #tpu.memory_space<vmem>>, %arg3: memref<8x1xf32, #tpu.memory_space<vmem>>, %arg4: memref<8x9xf32, #tpu.memory_space<vmem>>, %arg5: memref<8x1xf32, #tpu.memory_space<vmem>>, %arg6: memref<8x1xf32, #tpu.memory_space<vmem>>, %arg7: memref<8x8xf32, #tpu.memory_space<vmem>>, %arg8: memref<8x1xf32, #tpu.memory_space<vmem>>, %arg9: memref<8x128xf32, #tpu.memory_space<vmem>>) attributes {dimension_semantics = [], scalar_prefetch = 0 : i64, scratch_operands = 0 : i64, tpu.core_type = #tpu.core_type<tc>} {
    %c0 = arith.constant 0 : index
    %c0_0 = arith.constant 0 : index
    %c0_1 = arith.constant 0 : index
    %0 = vector.load %arg0[%c0, %c0_0, %c0_1] : memref<4x4x128xf32, #tpu.memory_space<vmem>>, vector<4x4x128xf32>
    %c0_2 = arith.constant 0 : index
    %c0_3 = arith.constant 0 : index
    %1 = vector.load %arg2[%c0_2, %c0_3] : memref<8x4xf32, #tpu.memory_space<vmem>>, vector<8x4xf32>
    %c0_4 = arith.constant 0 : index
    %c0_5 = arith.constant 0 : index
    %2 = vector.load %arg3[%c0_4, %c0_5] : memref<8x1xf32, #tpu.memory_space<vmem>>, vector<8x1xf32>
    %3 = vector.extract_strided_slice %1 {offsets = [0, 0], sizes = [8, 1], strides = [1, 1]} : vector<8x4xf32> to vector<8x1xf32>
    %4 = vector.extract_strided_slice %0 {offsets = [0, 0, 0], sizes = [1, 1, 128], strides = [1, 1, 1]} : vector<4x4x128xf32> to vector<1x1x128xf32>
    %5 = vector.shape_cast %4 : vector<1x1x128xf32> to vector<128xf32>
    %6 = vector.shape_cast %5 : vector<128xf32> to vector<1x128xf32>
    %7 = vector.broadcast %3 : vector<8x1xf32> to vector<8x128xf32>
    %8 = vector.broadcast %6 : vector<1x128xf32> to vector<8x128xf32>
    %9 = arith.mulf %7, %8 : vector<8x128xf32>
    %10 = vector.extract_strided_slice %1 {offsets = [0, 1], sizes = [8, 1], strides = [1, 1]} : vector<8x4xf32> to vector<8x1xf32>
    %11 = vector.extract_strided_slice %0 {offsets = [0, 1, 0], sizes = [1, 1, 128], strides = [1, 1, 1]} : vector<4x4x128xf32> to vector<1x1x128xf32>
    %12 = vector.shape_cast %11 : vector<1x1x128xf32> to vector<128xf32>
    %13 = vector.shape_cast %12 : vector<128xf32> to vector<1x128xf32>
    %14 = vector.broadcast %10 : vector<8x1xf32> to vector<8x128xf32>
    %15 = vector.broadcast %13 : vector<1x128xf32> to vector<8x128xf32>
    %16 = arith.mulf %14, %15 : vector<8x128xf32>
    %17 = arith.addf %9, %16 : vector<8x128xf32>
    %18 = vector.extract_strided_slice %1 {offsets = [0, 2], sizes = [8, 1], strides = [1, 1]} : vector<8x4xf32> to vector<8x1xf32>
    %19 = vector.extract_strided_slice %0 {offsets = [0, 2, 0], sizes = [1, 1, 128], strides = [1, 1, 1]} : vector<4x4x128xf32> to vector<1x1x128xf32>
    %20 = vector.shape_cast %19 : vector<1x1x128xf32> to vector<128xf32>
    %21 = vector.shape_cast %20 : vector<128xf32> to vector<1x128xf32>
    %22 = vector.broadcast %18 : vector<8x1xf32> to vector<8x128xf32>
    %23 = vector.broadcast %21 : vector<1x128xf32> to vector<8x128xf32>
    %24 = arith.mulf %22, %23 : vector<8x128xf32>
    %25 = arith.addf %17, %24 : vector<8x128xf32>
    %26 = vector.extract_strided_slice %1 {offsets = [0, 3], sizes = [8, 1], strides = [1, 1]} : vector<8x4xf32> to vector<8x1xf32>
    %27 = vector.extract_strided_slice %0 {offsets = [0, 3, 0], sizes = [1, 1, 128], strides = [1, 1, 1]} : vector<4x4x128xf32> to vector<1x1x128xf32>
    %28 = vector.shape_cast %27 : vector<1x1x128xf32> to vector<128xf32>
    %29 = vector.shape_cast %28 : vector<128xf32> to vector<1x128xf32>
    %30 = vector.broadcast %26 : vector<8x1xf32> to vector<8x128xf32>
    %31 = vector.broadcast %29 : vector<1x128xf32> to vector<8x128xf32>
    %32 = arith.mulf %30, %31 : vector<8x128xf32>
    %33 = arith.addf %25, %32 : vector<8x128xf32>
    %34 = vector.broadcast %2 : vector<8x1xf32> to vector<8x128xf32>
    %35 = arith.addf %33, %34 : vector<8x128xf32>
    %cst = arith.constant 0.000000e+00 : f32
    %36 = vector.broadcast %cst : f32 to vector<8x128xf32>
    %37 = arith.maximumf %35, %36 : vector<8x128xf32>
    %38 = vector.extract_strided_slice %1 {offsets = [0, 0], sizes = [8, 1], strides = [1, 1]} : vector<8x4xf32> to vector<8x1xf32>
    %39 = vector.extract_strided_slice %0 {offsets = [1, 0, 0], sizes = [1, 1, 128], strides = [1, 1, 1]} : vector<4x4x128xf32> to vector<1x1x128xf32>
    %40 = vector.shape_cast %39 : vector<1x1x128xf32> to vector<128xf32>
    %41 = vector.shape_cast %40 : vector<128xf32> to vector<1x128xf32>
    %42 = vector.broadcast %38 : vector<8x1xf32> to vector<8x128xf32>
    %43 = vector.broadcast %41 : vector<1x128xf32> to vector<8x128xf32>
    %44 = arith.mulf %42, %43 : vector<8x128xf32>
    %45 = vector.extract_strided_slice %1 {offsets = [0, 1], sizes = [8, 1], strides = [1, 1]} : vector<8x4xf32> to vector<8x1xf32>
    %46 = vector.extract_strided_slice %0 {offsets = [1, 1, 0], sizes = [1, 1, 128], strides = [1, 1, 1]} : vector<4x4x128xf32> to vector<1x1x128xf32>
    %47 = vector.shape_cast %46 : vector<1x1x128xf32> to vector<128xf32>
    %48 = vector.shape_cast %47 : vector<128xf32> to vector<1x128xf32>
    %49 = vector.broadcast %45 : vector<8x1xf32> to vector<8x128xf32>
    %50 = vector.broadcast %48 : vector<1x128xf32> to vector<8x128xf32>
    %51 = arith.mulf %49, %50 : vector<8x128xf32>
    %52 = arith.addf %44, %51 : vector<8x128xf32>
    %53 = vector.extract_strided_slice %1 {offsets = [0, 2], sizes = [8, 1], strides = [1, 1]} : vector<8x4xf32> to vector<8x1xf32>
    %54 = vector.extract_strided_slice %0 {offsets = [1, 2, 0], sizes = [1, 1, 128], strides = [1, 1, 1]} : vector<4x4x128xf32> to vector<1x1x128xf32>
    %55 = vector.shape_cast %54 : vector<1x1x128xf32> to vector<128xf32>
    %56 = vector.shape_cast %55 : vector<128xf32> to vector<1x128xf32>
    %57 = vector.broadcast %53 : vector<8x1xf32> to vector<8x128xf32>
    %58 = vector.broadcast %56 : vector<1x128xf32> to vector<8x128xf32>
    %59 = arith.mulf %57, %58 : vector<8x128xf32>
    %60 = arith.addf %52, %59 : vector<8x128xf32>
    %61 = vector.extract_strided_slice %1 {offsets = [0, 3], sizes = [8, 1], strides = [1, 1]} : vector<8x4xf32> to vector<8x1xf32>
    %62 = vector.extract_strided_slice %0 {offsets = [1, 3, 0], sizes = [1, 1, 128], strides = [1, 1, 1]} : vector<4x4x128xf32> to vector<1x1x128xf32>
    %63 = vector.shape_cast %62 : vector<1x1x128xf32> to vector<128xf32>
    %64 = vector.shape_cast %63 : vector<128xf32> to vector<1x128xf32>
    %65 = vector.broadcast %61 : vector<8x1xf32> to vector<8x128xf32>
    %66 = vector.broadcast %64 : vector<1x128xf32> to vector<8x128xf32>
    %67 = arith.mulf %65, %66 : vector<8x128xf32>
    %68 = arith.addf %60, %67 : vector<8x128xf32>
    %69 = vector.broadcast %2 : vector<8x1xf32> to vector<8x128xf32>
    %70 = arith.addf %68, %69 : vector<8x128xf32>
    %cst_6 = arith.constant 0.000000e+00 : f32
    %71 = vector.broadcast %cst_6 : f32 to vector<8x128xf32>
    %72 = arith.maximumf %70, %71 : vector<8x128xf32>
    %73 = arith.addf %37, %72 : vector<8x128xf32>
    %74 = vector.extract_strided_slice %1 {offsets = [0, 0], sizes = [8, 1], strides = [1, 1]} : vector<8x4xf32> to vector<8x1xf32>
    %75 = vector.extract_strided_slice %0 {offsets = [2, 0, 0], sizes = [1, 1, 128], strides = [1, 1, 1]} : vector<4x4x128xf32> to vector<1x1x128xf32>
    %76 = vector.shape_cast %75 : vector<1x1x128xf32> to vector<128xf32>
    %77 = vector.shape_cast %76 : vector<128xf32> to vector<1x128xf32>
    %78 = vector.broadcast %74 : vector<8x1xf32> to vector<8x128xf32>
    %79 = vector.broadcast %77 : vector<1x128xf32> to vector<8x128xf32>
    %80 = arith.mulf %78, %79 : vector<8x128xf32>
    %81 = vector.extract_strided_slice %1 {offsets = [0, 1], sizes = [8, 1], strides = [1, 1]} : vector<8x4xf32> to vector<8x1xf32>
    %82 = vector.extract_strided_slice %0 {offsets = [2, 1, 0], sizes = [1, 1, 128], strides = [1, 1, 1]} : vector<4x4x128xf32> to vector<1x1x128xf32>
    %83 = vector.shape_cast %82 : vector<1x1x128xf32> to vector<128xf32>
    %84 = vector.shape_cast %83 : vector<128xf32> to vector<1x128xf32>
    %85 = vector.broadcast %81 : vector<8x1xf32> to vector<8x128xf32>
    %86 = vector.broadcast %84 : vector<1x128xf32> to vector<8x128xf32>
    %87 = arith.mulf %85, %86 : vector<8x128xf32>
    %88 = arith.addf %80, %87 : vector<8x128xf32>
    %89 = vector.extract_strided_slice %1 {offsets = [0, 2], sizes = [8, 1], strides = [1, 1]} : vector<8x4xf32> to vector<8x1xf32>
    %90 = vector.extract_strided_slice %0 {offsets = [2, 2, 0], sizes = [1, 1, 128], strides = [1, 1, 1]} : vector<4x4x128xf32> to vector<1x1x128xf32>
    %91 = vector.shape_cast %90 : vector<1x1x128xf32> to vector<128xf32>
    %92 = vector.shape_cast %91 : vector<128xf32> to vector<1x128xf32>
    %93 = vector.broadcast %89 : vector<8x1xf32> to vector<8x128xf32>
    %94 = vector.broadcast %92 : vector<1x128xf32> to vector<8x128xf32>
    %95 = arith.mulf %93, %94 : vector<8x128xf32>
    %96 = arith.addf %88, %95 : vector<8x128xf32>
    %97 = vector.extract_strided_slice %1 {offsets = [0, 3], sizes = [8, 1], strides = [1, 1]} : vector<8x4xf32> to vector<8x1xf32>
    %98 = vector.extract_strided_slice %0 {offsets = [2, 3, 0], sizes = [1, 1, 128], strides = [1, 1, 1]} : vector<4x4x128xf32> to vector<1x1x128xf32>
    %99 = vector.shape_cast %98 : vector<1x1x128xf32> to vector<128xf32>
    %100 = vector.shape_cast %99 : vector<128xf32> to vector<1x128xf32>
    %101 = vector.broadcast %97 : vector<8x1xf32> to vector<8x128xf32>
    %102 = vector.broadcast %100 : vector<1x128xf32> to vector<8x128xf32>
    %103 = arith.mulf %101, %102 : vector<8x128xf32>
    %104 = arith.addf %96, %103 : vector<8x128xf32>
    %105 = vector.broadcast %2 : vector<8x1xf32> to vector<8x128xf32>
    %106 = arith.addf %104, %105 : vector<8x128xf32>
    %cst_7 = arith.constant 0.000000e+00 : f32
    %107 = vector.broadcast %cst_7 : f32 to vector<8x128xf32>
    %108 = arith.maximumf %106, %107 : vector<8x128xf32>
    %109 = arith.addf %73, %108 : vector<8x128xf32>
    %110 = vector.extract_strided_slice %1 {offsets = [0, 0], sizes = [8, 1], strides = [1, 1]} : vector<8x4xf32> to vector<8x1xf32>
    %111 = vector.extract_strided_slice %0 {offsets = [3, 0, 0], sizes = [1, 1, 128], strides = [1, 1, 1]} : vector<4x4x128xf32> to vector<1x1x128xf32>
    %112 = vector.shape_cast %111 : vector<1x1x128xf32> to vector<128xf32>
    %113 = vector.shape_cast %112 : vector<128xf32> to vector<1x128xf32>
    %114 = vector.broadcast %110 : vector<8x1xf32> to vector<8x128xf32>
    %115 = vector.broadcast %113 : vector<1x128xf32> to vector<8x128xf32>
    %116 = arith.mulf %114, %115 : vector<8x128xf32>
    %117 = vector.extract_strided_slice %1 {offsets = [0, 1], sizes = [8, 1], strides = [1, 1]} : vector<8x4xf32> to vector<8x1xf32>
    %118 = vector.extract_strided_slice %0 {offsets = [3, 1, 0], sizes = [1, 1, 128], strides = [1, 1, 1]} : vector<4x4x128xf32> to vector<1x1x128xf32>
    %119 = vector.shape_cast %118 : vector<1x1x128xf32> to vector<128xf32>
    %120 = vector.shape_cast %119 : vector<128xf32> to vector<1x128xf32>
    %121 = vector.broadcast %117 : vector<8x1xf32> to vector<8x128xf32>
    %122 = vector.broadcast %120 : vector<1x128xf32> to vector<8x128xf32>
    %123 = arith.mulf %121, %122 : vector<8x128xf32>
    %124 = arith.addf %116, %123 : vector<8x128xf32>
    %125 = vector.extract_strided_slice %1 {offsets = [0, 2], sizes = [8, 1], strides = [1, 1]} : vector<8x4xf32> to vector<8x1xf32>
    %126 = vector.extract_strided_slice %0 {offsets = [3, 2, 0], sizes = [1, 1, 128], strides = [1, 1, 1]} : vector<4x4x128xf32> to vector<1x1x128xf32>
    %127 = vector.shape_cast %126 : vector<1x1x128xf32> to vector<128xf32>
    %128 = vector.shape_cast %127 : vector<128xf32> to vector<1x128xf32>
    %129 = vector.broadcast %125 : vector<8x1xf32> to vector<8x128xf32>
    %130 = vector.broadcast %128 : vector<1x128xf32> to vector<8x128xf32>
    %131 = arith.mulf %129, %130 : vector<8x128xf32>
    %132 = arith.addf %124, %131 : vector<8x128xf32>
    %133 = vector.extract_strided_slice %1 {offsets = [0, 3], sizes = [8, 1], strides = [1, 1]} : vector<8x4xf32> to vector<8x1xf32>
    %134 = vector.extract_strided_slice %0 {offsets = [3, 3, 0], sizes = [1, 1, 128], strides = [1, 1, 1]} : vector<4x4x128xf32> to vector<1x1x128xf32>
    %135 = vector.shape_cast %134 : vector<1x1x128xf32> to vector<128xf32>
    %136 = vector.shape_cast %135 : vector<128xf32> to vector<1x128xf32>
    %137 = vector.broadcast %133 : vector<8x1xf32> to vector<8x128xf32>
    %138 = vector.broadcast %136 : vector<1x128xf32> to vector<8x128xf32>
    %139 = arith.mulf %137, %138 : vector<8x128xf32>
    %140 = arith.addf %132, %139 : vector<8x128xf32>
    %141 = vector.broadcast %2 : vector<8x1xf32> to vector<8x128xf32>
    %142 = arith.addf %140, %141 : vector<8x128xf32>
    %cst_8 = arith.constant 0.000000e+00 : f32
    %143 = vector.broadcast %cst_8 : f32 to vector<8x128xf32>
    %144 = arith.maximumf %142, %143 : vector<8x128xf32>
    %145 = arith.addf %109, %144 : vector<8x128xf32>
    %cst_9 = arith.constant 2.500000e-01 : f32
    %146 = vector.broadcast %cst_9 : f32 to vector<8x128xf32>
    %147 = arith.mulf %145, %146 : vector<8x128xf32>
    %c0_10 = arith.constant 0 : index
    %c0_11 = arith.constant 0 : index
    %148 = vector.load %arg4[%c0_10, %c0_11] : memref<8x9xf32, #tpu.memory_space<vmem>>, vector<8x9xf32>
    %c0_12 = arith.constant 0 : index
    %c0_13 = arith.constant 0 : index
    %149 = vector.load %arg5[%c0_12, %c0_13] : memref<8x1xf32, #tpu.memory_space<vmem>>, vector<8x1xf32>
    %c0_14 = arith.constant 0 : index
    %c0_15 = arith.constant 0 : index
    %150 = vector.load %arg6[%c0_14, %c0_15] : memref<8x1xf32, #tpu.memory_space<vmem>>, vector<8x1xf32>
    %151 = vector.broadcast %149 : vector<8x1xf32> to vector<8x128xf32>
    %152 = arith.mulf %147, %151 : vector<8x128xf32>
    %153 = vector.broadcast %150 : vector<8x1xf32> to vector<8x128xf32>
    %154 = arith.addf %152, %153 : vector<8x128xf32>
    %155 = vector.extract_strided_slice %147 {offsets = [0, 110], sizes = [8, 18], strides = [1, 1]} : vector<8x128xf32> to vector<8x18xf32>
    %156 = vector.extract_strided_slice %147 {offsets = [0, 0], sizes = [8, 110], strides = [1, 1]} : vector<8x128xf32> to vector<8x110xf32>
    %157 = tpu.concatenate %155, %156 in 1 : vector<8x18xf32>, vector<8x110xf32> -> vector<8x128xf32>
    %c0_16 = arith.constant 0 : index
    %c0_17 = arith.constant 0 : index
    %158 = vector.load %arg1[%c0_16, %c0_17] : memref<9x128xf32, #tpu.memory_space<vmem>>, vector<1x128xf32>
    %159 = vector.shape_cast %158 : vector<1x128xf32> to vector<128xf32>
    %160 = vector.shape_cast %159 : vector<128xf32> to vector<1x128xf32>
    %161 = vector.broadcast %160 : vector<1x128xf32> to vector<8x128xf32>
    %162 = arith.mulf %157, %161 : vector<8x128xf32>
    %163 = vector.extract_strided_slice %148 {offsets = [0, 0], sizes = [8, 1], strides = [1, 1]} : vector<8x9xf32> to vector<8x1xf32>
    %164 = vector.broadcast %163 : vector<8x1xf32> to vector<8x128xf32>
    %165 = arith.mulf %162, %164 : vector<8x128xf32>
    %166 = arith.addf %154, %165 : vector<8x128xf32>
    %167 = vector.extract_strided_slice %147 {offsets = [0, 112], sizes = [8, 16], strides = [1, 1]} : vector<8x128xf32> to vector<8x16xf32>
    %168 = vector.extract_strided_slice %147 {offsets = [0, 0], sizes = [8, 112], strides = [1, 1]} : vector<8x128xf32> to vector<8x112xf32>
    %169 = tpu.concatenate %167, %168 in 1 : vector<8x16xf32>, vector<8x112xf32> -> vector<8x128xf32>
    %c1 = arith.constant 1 : index
    %c0_18 = arith.constant 0 : index
    %170 = vector.load %arg1[%c1, %c0_18] : memref<9x128xf32, #tpu.memory_space<vmem>>, vector<1x128xf32>
    %171 = vector.shape_cast %170 : vector<1x128xf32> to vector<128xf32>
    %172 = vector.shape_cast %171 : vector<128xf32> to vector<1x128xf32>
    %173 = vector.broadcast %172 : vector<1x128xf32> to vector<8x128xf32>
    %174 = arith.mulf %169, %173 : vector<8x128xf32>
    %175 = vector.extract_strided_slice %148 {offsets = [0, 1], sizes = [8, 1], strides = [1, 1]} : vector<8x9xf32> to vector<8x1xf32>
    %176 = vector.broadcast %175 : vector<8x1xf32> to vector<8x128xf32>
    %177 = arith.mulf %174, %176 : vector<8x128xf32>
    %178 = arith.addf %166, %177 : vector<8x128xf32>
    %179 = vector.extract_strided_slice %147 {offsets = [0, 114], sizes = [8, 14], strides = [1, 1]} : vector<8x128xf32> to vector<8x14xf32>
    %180 = vector.extract_strided_slice %147 {offsets = [0, 0], sizes = [8, 114], strides = [1, 1]} : vector<8x128xf32> to vector<8x114xf32>
    %181 = tpu.concatenate %179, %180 in 1 : vector<8x14xf32>, vector<8x114xf32> -> vector<8x128xf32>
    %c2 = arith.constant 2 : index
    %c0_19 = arith.constant 0 : index
    %182 = vector.load %arg1[%c2, %c0_19] : memref<9x128xf32, #tpu.memory_space<vmem>>, vector<1x128xf32>
    %183 = vector.shape_cast %182 : vector<1x128xf32> to vector<128xf32>
    %184 = vector.shape_cast %183 : vector<128xf32> to vector<1x128xf32>
    %185 = vector.broadcast %184 : vector<1x128xf32> to vector<8x128xf32>
    %186 = arith.mulf %181, %185 : vector<8x128xf32>
    %187 = vector.extract_strided_slice %148 {offsets = [0, 2], sizes = [8, 1], strides = [1, 1]} : vector<8x9xf32> to vector<8x1xf32>
    %188 = vector.broadcast %187 : vector<8x1xf32> to vector<8x128xf32>
    %189 = arith.mulf %186, %188 : vector<8x128xf32>
    %190 = arith.addf %178, %189 : vector<8x128xf32>
    %191 = vector.extract_strided_slice %147 {offsets = [0, 126], sizes = [8, 2], strides = [1, 1]} : vector<8x128xf32> to vector<8x2xf32>
    %192 = vector.extract_strided_slice %147 {offsets = [0, 0], sizes = [8, 126], strides = [1, 1]} : vector<8x128xf32> to vector<8x126xf32>
    %193 = tpu.concatenate %191, %192 in 1 : vector<8x2xf32>, vector<8x126xf32> -> vector<8x128xf32>
    %c3 = arith.constant 3 : index
    %c0_20 = arith.constant 0 : index
    %194 = vector.load %arg1[%c3, %c0_20] : memref<9x128xf32, #tpu.memory_space<vmem>>, vector<1x128xf32>
    %195 = vector.shape_cast %194 : vector<1x128xf32> to vector<128xf32>
    %196 = vector.shape_cast %195 : vector<128xf32> to vector<1x128xf32>
    %197 = vector.broadcast %196 : vector<1x128xf32> to vector<8x128xf32>
    %198 = arith.mulf %193, %197 : vector<8x128xf32>
    %199 = vector.extract_strided_slice %148 {offsets = [0, 3], sizes = [8, 1], strides = [1, 1]} : vector<8x9xf32> to vector<8x1xf32>
    %200 = vector.broadcast %199 : vector<8x1xf32> to vector<8x128xf32>
    %201 = arith.mulf %198, %200 : vector<8x128xf32>
    %202 = arith.addf %190, %201 : vector<8x128xf32>
    %c4 = arith.constant 4 : index
    %c0_21 = arith.constant 0 : index
    %203 = vector.load %arg1[%c4, %c0_21] : memref<9x128xf32, #tpu.memory_space<vmem>>, vector<1x128xf32>
    %204 = vector.shape_cast %203 : vector<1x128xf32> to vector<128xf32>
    %205 = vector.shape_cast %204 : vector<128xf32> to vector<1x128xf32>
    %206 = vector.broadcast %205 : vector<1x128xf32> to vector<8x128xf32>
    %207 = arith.mulf %147, %206 : vector<8x128xf32>
    %208 = vector.extract_strided_slice %148 {offsets = [0, 4], sizes = [8, 1], strides = [1, 1]} : vector<8x9xf32> to vector<8x1xf32>
    %209 = vector.broadcast %208 : vector<8x1xf32> to vector<8x128xf32>
    %210 = arith.mulf %207, %209 : vector<8x128xf32>
    %211 = arith.addf %202, %210 : vector<8x128xf32>
    %212 = vector.extract_strided_slice %147 {offsets = [0, 2], sizes = [8, 126], strides = [1, 1]} : vector<8x128xf32> to vector<8x126xf32>
    %213 = vector.extract_strided_slice %147 {offsets = [0, 0], sizes = [8, 2], strides = [1, 1]} : vector<8x128xf32> to vector<8x2xf32>
    %214 = tpu.concatenate %212, %213 in 1 : vector<8x126xf32>, vector<8x2xf32> -> vector<8x128xf32>
    %c5 = arith.constant 5 : index
    %c0_22 = arith.constant 0 : index
    %215 = vector.load %arg1[%c5, %c0_22] : memref<9x128xf32, #tpu.memory_space<vmem>>, vector<1x128xf32>
    %216 = vector.shape_cast %215 : vector<1x128xf32> to vector<128xf32>
    %217 = vector.shape_cast %216 : vector<128xf32> to vector<1x128xf32>
    %218 = vector.broadcast %217 : vector<1x128xf32> to vector<8x128xf32>
    %219 = arith.mulf %214, %218 : vector<8x128xf32>
    %220 = vector.extract_strided_slice %148 {offsets = [0, 5], sizes = [8, 1], strides = [1, 1]} : vector<8x9xf32> to vector<8x1xf32>
    %221 = vector.broadcast %220 : vector<8x1xf32> to vector<8x128xf32>
    %222 = arith.mulf %219, %221 : vector<8x128xf32>
    %223 = arith.addf %211, %222 : vector<8x128xf32>
    %224 = vector.extract_strided_slice %147 {offsets = [0, 14], sizes = [8, 114], strides = [1, 1]} : vector<8x128xf32> to vector<8x114xf32>
    %225 = vector.extract_strided_slice %147 {offsets = [0, 0], sizes = [8, 14], strides = [1, 1]} : vector<8x128xf32> to vector<8x14xf32>
    %226 = tpu.concatenate %224, %225 in 1 : vector<8x114xf32>, vector<8x14xf32> -> vector<8x128xf32>
    %c6 = arith.constant 6 : index
    %c0_23 = arith.constant 0 : index
    %227 = vector.load %arg1[%c6, %c0_23] : memref<9x128xf32, #tpu.memory_space<vmem>>, vector<1x128xf32>
    %228 = vector.shape_cast %227 : vector<1x128xf32> to vector<128xf32>
    %229 = vector.shape_cast %228 : vector<128xf32> to vector<1x128xf32>
    %230 = vector.broadcast %229 : vector<1x128xf32> to vector<8x128xf32>
    %231 = arith.mulf %226, %230 : vector<8x128xf32>
    %232 = vector.extract_strided_slice %148 {offsets = [0, 6], sizes = [8, 1], strides = [1, 1]} : vector<8x9xf32> to vector<8x1xf32>
    %233 = vector.broadcast %232 : vector<8x1xf32> to vector<8x128xf32>
    %234 = arith.mulf %231, %233 : vector<8x128xf32>
    %235 = arith.addf %223, %234 : vector<8x128xf32>
    %236 = vector.extract_strided_slice %147 {offsets = [0, 16], sizes = [8, 112], strides = [1, 1]} : vector<8x128xf32> to vector<8x112xf32>
    %237 = vector.extract_strided_slice %147 {offsets = [0, 0], sizes = [8, 16], strides = [1, 1]} : vector<8x128xf32> to vector<8x16xf32>
    %238 = tpu.concatenate %236, %237 in 1 : vector<8x112xf32>, vector<8x16xf32> -> vector<8x128xf32>
    %c7 = arith.constant 7 : index
    %c0_24 = arith.constant 0 : index
    %239 = vector.load %arg1[%c7, %c0_24] : memref<9x128xf32, #tpu.memory_space<vmem>>, vector<1x128xf32>
    %240 = vector.shape_cast %239 : vector<1x128xf32> to vector<128xf32>
    %241 = vector.shape_cast %240 : vector<128xf32> to vector<1x128xf32>
    %242 = vector.broadcast %241 : vector<1x128xf32> to vector<8x128xf32>
    %243 = arith.mulf %238, %242 : vector<8x128xf32>
    %244 = vector.extract_strided_slice %148 {offsets = [0, 7], sizes = [8, 1], strides = [1, 1]} : vector<8x9xf32> to vector<8x1xf32>
    %245 = vector.broadcast %244 : vector<8x1xf32> to vector<8x128xf32>
    %246 = arith.mulf %243, %245 : vector<8x128xf32>
    %247 = arith.addf %235, %246 : vector<8x128xf32>
    %248 = vector.extract_strided_slice %147 {offsets = [0, 18], sizes = [8, 110], strides = [1, 1]} : vector<8x128xf32> to vector<8x110xf32>
    %249 = vector.extract_strided_slice %147 {offsets = [0, 0], sizes = [8, 18], strides = [1, 1]} : vector<8x128xf32> to vector<8x18xf32>
    %250 = tpu.concatenate %248, %249 in 1 : vector<8x110xf32>, vector<8x18xf32> -> vector<8x128xf32>
    %c8 = arith.constant 8 : index
    %c0_25 = arith.constant 0 : index
    %251 = vector.load %arg1[%c8, %c0_25] : memref<9x128xf32, #tpu.memory_space<vmem>>, vector<1x128xf32>
    %252 = vector.shape_cast %251 : vector<1x128xf32> to vector<128xf32>
    %253 = vector.shape_cast %252 : vector<128xf32> to vector<1x128xf32>
    %254 = vector.broadcast %253 : vector<1x128xf32> to vector<8x128xf32>
    %255 = arith.mulf %250, %254 : vector<8x128xf32>
    %256 = vector.extract_strided_slice %148 {offsets = [0, 8], sizes = [8, 1], strides = [1, 1]} : vector<8x9xf32> to vector<8x1xf32>
    %257 = vector.broadcast %256 : vector<8x1xf32> to vector<8x128xf32>
    %258 = arith.mulf %255, %257 : vector<8x128xf32>
    %259 = arith.addf %247, %258 : vector<8x128xf32>
    %cst_26 = arith.constant 0.000000e+00 : f32
    %260 = vector.broadcast %cst_26 : f32 to vector<8x128xf32>
    %261 = arith.maximumf %259, %260 : vector<8x128xf32>
    %c0_27 = arith.constant 0 : index
    %c0_28 = arith.constant 0 : index
    %262 = vector.load %arg7[%c0_27, %c0_28] : memref<8x8xf32, #tpu.memory_space<vmem>>, vector<8x8xf32>
    %c0_29 = arith.constant 0 : index
    %c0_30 = arith.constant 0 : index
    %263 = vector.load %arg8[%c0_29, %c0_30] : memref<8x1xf32, #tpu.memory_space<vmem>>, vector<8x1xf32>
    %264 = vector.extract_strided_slice %262 {offsets = [0, 0], sizes = [8, 1], strides = [1, 1]} : vector<8x8xf32> to vector<8x1xf32>
    %265 = vector.extract_strided_slice %261 {offsets = [0, 0], sizes = [1, 128], strides = [1, 1]} : vector<8x128xf32> to vector<1x128xf32>
    %266 = vector.shape_cast %265 : vector<1x128xf32> to vector<128xf32>
    %267 = vector.shape_cast %266 : vector<128xf32> to vector<1x128xf32>
    %268 = vector.broadcast %264 : vector<8x1xf32> to vector<8x128xf32>
    %269 = vector.broadcast %267 : vector<1x128xf32> to vector<8x128xf32>
    %270 = arith.mulf %268, %269 : vector<8x128xf32>
    %271 = vector.extract_strided_slice %262 {offsets = [0, 1], sizes = [8, 1], strides = [1, 1]} : vector<8x8xf32> to vector<8x1xf32>
    %272 = vector.extract_strided_slice %261 {offsets = [1, 0], sizes = [1, 128], strides = [1, 1]} : vector<8x128xf32> to vector<1x128xf32>
    %273 = vector.shape_cast %272 : vector<1x128xf32> to vector<128xf32>
    %274 = vector.shape_cast %273 : vector<128xf32> to vector<1x128xf32>
    %275 = vector.broadcast %271 : vector<8x1xf32> to vector<8x128xf32>
    %276 = vector.broadcast %274 : vector<1x128xf32> to vector<8x128xf32>
    %277 = arith.mulf %275, %276 : vector<8x128xf32>
    %278 = arith.addf %270, %277 : vector<8x128xf32>
    %279 = vector.extract_strided_slice %262 {offsets = [0, 2], sizes = [8, 1], strides = [1, 1]} : vector<8x8xf32> to vector<8x1xf32>
    %280 = vector.extract_strided_slice %261 {offsets = [2, 0], sizes = [1, 128], strides = [1, 1]} : vector<8x128xf32> to vector<1x128xf32>
    %281 = vector.shape_cast %280 : vector<1x128xf32> to vector<128xf32>
    %282 = vector.shape_cast %281 : vector<128xf32> to vector<1x128xf32>
    %283 = vector.broadcast %279 : vector<8x1xf32> to vector<8x128xf32>
    %284 = vector.broadcast %282 : vector<1x128xf32> to vector<8x128xf32>
    %285 = arith.mulf %283, %284 : vector<8x128xf32>
    %286 = arith.addf %278, %285 : vector<8x128xf32>
    %287 = vector.extract_strided_slice %262 {offsets = [0, 3], sizes = [8, 1], strides = [1, 1]} : vector<8x8xf32> to vector<8x1xf32>
    %288 = vector.extract_strided_slice %261 {offsets = [3, 0], sizes = [1, 128], strides = [1, 1]} : vector<8x128xf32> to vector<1x128xf32>
    %289 = vector.shape_cast %288 : vector<1x128xf32> to vector<128xf32>
    %290 = vector.shape_cast %289 : vector<128xf32> to vector<1x128xf32>
    %291 = vector.broadcast %287 : vector<8x1xf32> to vector<8x128xf32>
    %292 = vector.broadcast %290 : vector<1x128xf32> to vector<8x128xf32>
    %293 = arith.mulf %291, %292 : vector<8x128xf32>
    %294 = arith.addf %286, %293 : vector<8x128xf32>
    %295 = vector.extract_strided_slice %262 {offsets = [0, 4], sizes = [8, 1], strides = [1, 1]} : vector<8x8xf32> to vector<8x1xf32>
    %296 = vector.extract_strided_slice %261 {offsets = [4, 0], sizes = [1, 128], strides = [1, 1]} : vector<8x128xf32> to vector<1x128xf32>
    %297 = vector.shape_cast %296 : vector<1x128xf32> to vector<128xf32>
    %298 = vector.shape_cast %297 : vector<128xf32> to vector<1x128xf32>
    %299 = vector.broadcast %295 : vector<8x1xf32> to vector<8x128xf32>
    %300 = vector.broadcast %298 : vector<1x128xf32> to vector<8x128xf32>
    %301 = arith.mulf %299, %300 : vector<8x128xf32>
    %302 = arith.addf %294, %301 : vector<8x128xf32>
    %303 = vector.extract_strided_slice %262 {offsets = [0, 5], sizes = [8, 1], strides = [1, 1]} : vector<8x8xf32> to vector<8x1xf32>
    %304 = vector.extract_strided_slice %261 {offsets = [5, 0], sizes = [1, 128], strides = [1, 1]} : vector<8x128xf32> to vector<1x128xf32>
    %305 = vector.shape_cast %304 : vector<1x128xf32> to vector<128xf32>
    %306 = vector.shape_cast %305 : vector<128xf32> to vector<1x128xf32>
    %307 = vector.broadcast %303 : vector<8x1xf32> to vector<8x128xf32>
    %308 = vector.broadcast %306 : vector<1x128xf32> to vector<8x128xf32>
    %309 = arith.mulf %307, %308 : vector<8x128xf32>
    %310 = arith.addf %302, %309 : vector<8x128xf32>
    %311 = vector.extract_strided_slice %262 {offsets = [0, 6], sizes = [8, 1], strides = [1, 1]} : vector<8x8xf32> to vector<8x1xf32>
    %312 = vector.extract_strided_slice %261 {offsets = [6, 0], sizes = [1, 128], strides = [1, 1]} : vector<8x128xf32> to vector<1x128xf32>
    %313 = vector.shape_cast %312 : vector<1x128xf32> to vector<128xf32>
    %314 = vector.shape_cast %313 : vector<128xf32> to vector<1x128xf32>
    %315 = vector.broadcast %311 : vector<8x1xf32> to vector<8x128xf32>
    %316 = vector.broadcast %314 : vector<1x128xf32> to vector<8x128xf32>
    %317 = arith.mulf %315, %316 : vector<8x128xf32>
    %318 = arith.addf %310, %317 : vector<8x128xf32>
    %319 = vector.extract_strided_slice %262 {offsets = [0, 7], sizes = [8, 1], strides = [1, 1]} : vector<8x8xf32> to vector<8x1xf32>
    %320 = vector.extract_strided_slice %261 {offsets = [7, 0], sizes = [1, 128], strides = [1, 1]} : vector<8x128xf32> to vector<1x128xf32>
    %321 = vector.shape_cast %320 : vector<1x128xf32> to vector<128xf32>
    %322 = vector.shape_cast %321 : vector<128xf32> to vector<1x128xf32>
    %323 = vector.broadcast %319 : vector<8x1xf32> to vector<8x128xf32>
    %324 = vector.broadcast %322 : vector<1x128xf32> to vector<8x128xf32>
    %325 = arith.mulf %323, %324 : vector<8x128xf32>
    %326 = arith.addf %318, %325 : vector<8x128xf32>
    %327 = vector.broadcast %263 : vector<8x1xf32> to vector<8x128xf32>
    %328 = arith.addf %326, %327 : vector<8x128xf32>
    %cst_31 = arith.constant 0.000000e+00 : f32
    %329 = vector.broadcast %cst_31 : f32 to vector<8x128xf32>
    %330 = arith.maximumf %328, %329 : vector<8x128xf32>
    %c0_32 = arith.constant 0 : index
    %c0_33 = arith.constant 0 : index
    %331 = vector.load %arg9[%c0_32, %c0_33] : memref<8x128xf32, #tpu.memory_space<vmem>>, vector<8x128xf32>
    tpu.vector_store %arg9[%c0_32, %c0_33], %330 {strides = array<i32>} : memref<8x128xf32, #tpu.memory_space<vmem>>, vector<8x128xf32>,
    return
  }
}

</mosaic_0001>

<bundles_post_ra>
// kernel: tpu_custom_call.1
= control target key start
LH: loop header
LB: loop body
LE: loop exit
PB: predicated region body
PF: predicated region fallthrough
CT: control target
= control target key end

     0   :  { %v493_v1 = vmov 2   ;;  %v494_v2 = vmov 0   ;;  %s703_s0 = inlined_call_operand.vmem [shape: f32[4,4,128], index: 0, kind: input, shape index: {}]   ;;  %s704_s1 = inlined_call_operand.vmem [shape: f32[9,128], index: 1, kind: input, shape index: {}]   ;;  %s705_s2 = inlined_call_operand.vmem [shape: f32[8,4], index: 2, kind: input, shape index: {}]   ;;  %s706_s3 = inlined_call_operand.vmem [shape: f32[8,1], index: 3, kind: input, shape index: {}]   ;;  %s707_s4 = inlined_call_operand.vmem [shape: f32[8,9], index: 4, kind: input, shape index: {}]   ;;  %s708_s5 = inlined_call_operand.vmem [shape: f32[8,1], index: 5, kind: input, shape index: {}]   ;;  %s709_s6 = inlined_call_operand.vmem [shape: f32[8,1], index: 6, kind: input, shape index: {}]   ;;  %s710_s7 = inlined_call_operand.vmem [shape: f32[8,8], index: 7, kind: input, shape index: {}]   ;;  %s711_s8 = inlined_call_operand.vmem [shape: f32[8,1], index: 8, kind: input, shape index: {}]   ;;  %s712_s9 = inlined_call_operand.hbm [shape: f32[8,128], index: 9, kind: output, shape index: {}]  }
   0x1   :  { %v37_v0 = vld [vmem:[%s705_s2] sm:$0xff]  ;;  %448 = vset.pattern.permute.xlu1 %v493_v1  ;;  %446 = vset.pattern.permute.xlu0 %v494_v2 }
   0x2   :  { %60 = vperm.xlu1 %448, %v37_v0   ;;  %41 = vperm.xlu0 %446, %v37_v0  }
   0x3   :  { %14 = vsyncpa [#allocation3], 0  ;;  %v495_v3 = vmov 3   ;;  %v496_v4 = vmov 1   ;;  %v38_v5 = vld [vmem:[%s706_s3] sm:$0xff]  ;;  %v497_v9 = vmov 7   ;;  %v44_v14 = vlaneseq }
   0x4   :  { %v166_v6 = vld [vmem:[%s708_s5] sm:$0xff]  ;;  %v498_v10 = vmov 4   ;;  %v499_v11 = vmov 5   ;;  %v500_v12 = vmov 6   ;;  %v501_v13 = vmov 8   ;;  %s503_s22 = smov 18  }
   0x5   :  { %v167_v7 = vld [vmem:[%s709_s6] sm:$0xff]  ;;  %v588_v15 = vshrl.u32 %v44_v14, 7  ;;  %v35_v19 = vld [vmem:[%s703_s0 + $0x8] sm:$0xf]  ;;  %v36_v20 = vld [vmem:[%s703_s0 + $0xc] sm:$0xf] }
   0x6   :  { %449 = vset.pattern.permute.xlu1 %v495_v3  ;;  %447 = vset.pattern.permute.xlu0 %v496_v4  ;;  %v165_v8 = vld [vmem:[%s707_s4] sm:$0xff]  ;;  %s504_s23 = smov 2   ;;  %s505_s24 = smov 16  }
   0x7   :  { %70 = vperm.xlu1 %449, %v37_v0   ;;  %50 = vperm.xlu0 %447, %v37_v0   ;;  %v591_v16 = vsub.s32 0, %v588_v15  ;;  %v33_v17 = vld [vmem:[%s703_s0] sm:$0xf]  ;;  %v34_v18 = vld [vmem:[%s703_s0 + $0x4] sm:$0xf]  ;;  %v606_v21 = vsub.s32 2, %v588_v15 }
   0x8   :  { %v609_v22 = vsub.s32 1, %v588_v15  ;;  %v612_v23 = vsub.s32 3, %v588_v15  ;;  %s502_s0 = smov 14   ;;  %s506_s27 = smov 114  }
   0x9   :  { %v47_v25 = vrot.slane %v33_v17, %v591_v16  ;;  %v89_v26 = vrot.slane %v34_v18, %v591_v16  ;;  %v115_v27 = vrot.slane %v35_v19, %v591_v16  ;;  %v141_v28 = vrot.slane %v36_v20, %v591_v16  ;;  %s507_s28 = smov 110   ;;  %s508_s29 = smov 126  }
   0xa   :  { %v66_v30 = vrot.slane %v33_v17, %v606_v21  ;;  %v100_v31 = vrot.slane %v34_v18, %v606_v21  ;;  %v126_v32 = vrot.slane %v35_v19, %v606_v21  ;;  %v152_v33 = vrot.slane %v36_v20, %v606_v21  ;;  %s509_s30 = smov 112  }
   0xb   :  { %450 = vset.pattern.permute.xlu1 %v494_v2  ;;  %451 = vset.pattern.permute.xlu0 %v494_v2  ;;  %v56_v34 = vrot.slane %v33_v17, %v609_v22  ;;  %v94_v35 = vrot.slane %v34_v18, %v609_v22  ;;  %v120_v36 = vrot.slane %v35_v19, %v609_v22 }
   0xc   :  { %81 = vperm.xlu1 %450, %v38_v5   ;;  %170 = vperm.xlu0 %451, %v166_v6   ;;  %v146_v37 = vrot.slane %v36_v20, %v609_v22  ;;  %v76_v38 = vrot.slane %v33_v17, %v612_v23  ;;  %v106_v39 = vrot.slane %v34_v18, %v612_v23 }
   0xd   :  { %v132_v40 = vrot.slane %v35_v19, %v612_v23  ;;  %v158_v41 = vrot.slane %v36_v20, %v612_v23 }
  0x10   :  { %176 = vperm.xlu1 %450, %v167_v7   ;;  %453 = vset.pattern.permute.xlu0 %v495_v3 }
  0x11   :  { %237 = vperm.xlu0 %453, %v165_v8  }
  0x14   :  { %192 = vperm.xlu1 %450, %v165_v8  }
  0x15   :  { %457 = vset.pattern.permute.xlu0 %v497_v9 }
  0x16   :  { %294 = vperm.xlu0 %457, %v165_v8  }
  0x18   :  { %452 = vset.pattern.permute.xlu1 %v493_v1 }
  0x19   :  { %222 = vperm.xlu1 %452, %v165_v8  }
  0x1a   :  { %458 = vset.pattern.permute.xlu0 %v496_v4 }
  0x1b   :  { %207 = vperm.xlu0 %458, %v165_v8  }
  0x1d   :  { %454 = vset.pattern.permute.xlu1 %v498_v10 }
  0x1e   :  { %249 = vperm.xlu1 %454, %v165_v8  }
  0x22   :  { %455 = vset.pattern.permute.xlu1 %v499_v11 }
  0x23   :  { %264 = vperm.xlu1 %455, %v165_v8  }
  0x27   :  { %456 = vset.pattern.permute.xlu1 %v500_v12 }
  0x28   :  { %279 = vperm.xlu1 %456, %v165_v8  }
  0x2c   :  { %459 = vset.pattern.permute.xlu1 %v501_v13 }
  0x2d   :  { %309 = vperm.xlu1 %459, %v165_v8  }
  0x31   :  { %460 = vset.pattern.permute.xlu1 %v494_v2 }
  0x81   :  { %v42_v24 = vpop.permute.xlu0 %41  ;;  %v61_v29 = vpop.permute.xlu1 %60 }
  0x82   :  { %v48_v42 = vmul.f32 %v47_v25, %v42_v24  ;;  %v90_v43 = vmul.f32 %v89_v26, %v42_v24  ;;  %v116_v44 = vmul.f32 %v115_v27, %v42_v24  ;;  %v142_v45 = vmul.f32 %v141_v28, %v42_v24 }
  0x83   :  { %v67_v46 = vmul.f32 %v66_v30, %v61_v29  ;;  %v101_v47 = vmul.f32 %v100_v31, %v61_v29  ;;  %v127_v48 = vmul.f32 %v126_v32, %v61_v29  ;;  %v153_v49 = vmul.f32 %v152_v33, %v61_v29  ;;  %v315_v33 = vld [vmem:[%s710_s7] sm:$0xff] }
  0x86   :  { %v51_v50 = vpop.permute.xlu0 %50  ;;  %v71_v55 = vpop.permute.xlu1 %70 }
  0x87   :  { %v57_v51 = vmul.f32 %v56_v34, %v51_v50  ;;  %v95_v52 = vmul.f32 %v94_v35, %v51_v50  ;;  %v121_v53 = vmul.f32 %v120_v36, %v51_v50  ;;  %v147_v54 = vmul.f32 %v146_v37, %v51_v50 }
  0x88   :  { %v77_v56 = vmul.f32 %v76_v38, %v71_v55  ;;  %v107_v57 = vmul.f32 %v106_v39, %v71_v55  ;;  %v133_v58 = vmul.f32 %v132_v40, %v71_v55  ;;  %v159_v59 = vmul.f32 %v158_v41, %v71_v55  ;;  %v419_v41 = vld [vmem:[%s704_s1] ss:$0 sm:$0xff] }
  0x89   :  { %v58_v60 = vadd.f32 %v57_v51, %v48_v42  ;;  %v96_v61 = vadd.f32 %v95_v52, %v90_v43  ;;  %v122_v62 = vadd.f32 %v121_v53, %v116_v44  ;;  %v148_v63 = vadd.f32 %v147_v54, %v142_v45  ;;  %v422_v53 = vld [vmem:[%s704_s1 + $0x3] ss:$0 sm:$0xff] }
  0x8b   :  { %v68_v0 = vadd.f32 %v67_v46, %v58_v60  ;;  %v102_v4 = vadd.f32 %v101_v47, %v96_v61  ;;  %v128_v5 = vadd.f32 %v127_v48, %v122_v62  ;;  %v154_v6 = vadd.f32 %v153_v49, %v148_v63  ;;  %v82_v17 = vpop.permute.xlu1 %81  ;;  %v171_v36 = vpop.permute.xlu0 %170  ;;  %v421_v48 = vld [vmem:[%s704_s1 + $0x2] ss:$0 sm:$0xff] }
  0x8d   :  { %v78_v7 = vadd.f32 %v77_v56, %v68_v0  ;;  %v108_v8 = vadd.f32 %v107_v57, %v102_v4  ;;  %v134_v13 = vadd.f32 %v133_v58, %v128_v5  ;;  %v160_v14 = vadd.f32 %v159_v59, %v154_v6  ;;  %v423_v58 = vld [vmem:[%s704_s1 + $0x4] ss:$0 sm:$0xff]  ;;  %v425_v0 = vld [vmem:[%s704_s1 + $0x6] ss:$0 sm:$0xff]  ;;  %v424_v4 = vld [vmem:[%s704_s1 + $0x5] ss:$0 sm:$0xff] }
  0x8f   :  { %v84_v18 = vadd.f32 %v82_v17, %v78_v7  ;;  %v109_v19 = vadd.f32 %v108_v8, %v82_v17  ;;  %v135_v20 = vadd.f32 %v134_v13, %v82_v17  ;;  %v161_v26 = vadd.f32 %v160_v14, %v82_v17  ;;  %v427_v14 = vld [vmem:[%s704_s1 + $0x8] ss:$0 sm:$0xff] }
  0x90   :  { %v238_v37 = vpop.permute.xlu0 %237 }
  0x91   :  { %v85_v24 = vmax.f32 %v84_v18, 0.0  ;;  %v110_v25 = vmax.f32 %v109_v19, 0.0  ;;  %v136_v28 = vmax.f32 %v135_v20, 0.0  ;;  %v162_v30 = vmax.f32 %v161_v26, 0.0  ;;  %v426_v18 = vld [vmem:[%s704_s1 + $0x7] ss:$0 sm:$0xff] }
  0x93   :  { %v111_v27 = vadd.f32 %v110_v25, %v85_v24 }
  0x95   :  { %v137_v29 = vadd.f32 %v136_v28, %v111_v27  ;;  %v295_v39 = vpop.permute.xlu0 %294 }
  0x97   :  { %v163_v31 = vadd.f32 %v162_v30, %v137_v29 }
  0x99   :  { %v630_v32 = vmul.f32 0.25, %v163_v31 }
  0x9b   :  { %212 = vrot.lane.b32.xlu0 %v630_v32, %s502_s0  ;;  %181 = vrot.lane.b32.xlu1 %v630_v32, %s503_s22  ;;  %v173_v44 = vmul.f32 %v171_v36, %v630_v32  ;;  %v247_v62 = vmul.f32 %v423_v58, %v630_v32 }
  0x9f   :  { %227 = vrot.lane.b32.xlu0 %v630_v32, %s504_s23  ;;  %197 = vrot.lane.b32.xlu1 %v630_v32, %s505_s24 }
  0xa3   :  { %269 = vrot.lane.b32.xlu0 %v630_v32, %s506_s27  ;;  %319 = vperm.xlu1 %460, %v315_v33  }
  0xa7   :  { %299 = vrot.lane.b32.xlu0 %v630_v32, %s507_s28  ;;  %254 = vrot.lane.b32.xlu1 %v630_v32, %s508_s29 }
  0xa8   :  { %461 = vset.pattern.permute.xlu1 %v493_v1  ;;  %v316_v1 = vld [vmem:[%s711_s8] sm:$0xff] }
  0xab   :  { %328 = vperm.xlu0 %458, %v315_v33   ;;  %284 = vrot.lane.b32.xlu1 %v630_v32, %s509_s30 }
  0xaf   :  { %338 = vperm.xlu1 %461, %v315_v33   ;;  %463 = vset.pattern.permute.xlu0 %v498_v10 }
  0xb0   :  { %358 = vperm.xlu0 %463, %v315_v33  }
  0xb3   :  { %462 = vset.pattern.permute.xlu1 %v495_v3  ;;  %v177_v3 = vpop.permute.xlu1 %176 }
  0xb4   :  { %348 = vperm.xlu1 %462, %v315_v33   ;;  %466 = vset.pattern.permute.xlu0 %v497_v9  ;;  %v179_v49 = vadd.f32 %v177_v3, %v173_v44 }
  0xb5   :  { %388 = vperm.xlu0 %466, %v315_v33  }
  0xb7   :  { %v193_v10 = vpop.permute.xlu1 %192 }
  0xb8   :  { %464 = vset.pattern.permute.xlu1 %v499_v11 }
  0xb9   :  { %368 = vperm.xlu1 %464, %v315_v33   ;;  %468 = vset.pattern.permute.xlu0 %v494_v2 }
  0xbb   :  { %v223_v34 = vpop.permute.xlu1 %222 }
  0xbd   :  { %465 = vset.pattern.permute.xlu1 %v500_v12  ;;  %v208_v12 = vpop.permute.xlu0 %207 }
  0xbe   :  { %378 = vperm.xlu1 %465, %v315_v33  }
  0xbf   :  { %v250_v9 = vpop.permute.xlu1 %249 }
  0xc0   :  { %v252_v7 = vmul.f32 %v250_v9, %v247_v62 }
  0xc2   :  { %467 = vset.pattern.permute.xlu1 %v494_v2  ;;  %v420_v2 = vld [vmem:[%s704_s1 + $0x1] ss:$0 sm:$0xff]  ;;  %s510_s1 = smov [#allocation2]  }
  0xc3   :  { %399 = vperm.xlu1 %467, %v316_v1   ;;  %v265_v35 = vpop.permute.xlu1 %264  ;;  %s411_s22 = sshll.u32 %s510_s1, 4  ;;  %s412_s22 = int_to_ptr.vmem [resolvable:$true] %s411_s22 }
  0xc4   :  { %s469_s23 = scalar_lea.vmem %s412_s22, 128  ;;  %p474_p1 = scmp.lt.s32.totalorder %s412_s22, %s412_s22 }
  0xc5   :  { %p470_p0 = scmp.ne.s32.totalorder %s412_s22, %s469_s23  ;;  %p475_p2 = scmp.lt.s32.totalorder %s469_s23, %s469_s23 }
  0xc7   :  { %v280_v11 = vpop.permute.xlu1 %279  ;;  %p476_p3 = por %p475_p2, %p474_p1 }
  0xc9   :  { %p477_p4 = pnand %p476_p3, %p470_p0 }
  0xcb   :  { %v310_v38 = vpop.permute.xlu1 %309 }
 0x10d   :  { %v182_v40 = vpop.permute.xlu1 %181  ;;  %v213_v46 = vpop.permute.xlu0 %212 }
 0x10e   :  { %v189_v43 = vmul.f32 %v419_v41, %v182_v40  ;;  %v220_v51 = vmul.f32 %v421_v48, %v213_v46 }
 0x110   :  { %v195_v47 = vmul.f32 %v193_v10, %v189_v43  ;;  %v225_v56 = vmul.f32 %v223_v34, %v220_v51 }
 0x111   :  { %v198_v42 = vpop.permute.xlu1 %197  ;;  %v228_v54 = vpop.permute.xlu0 %227 }
 0x112   :  { %v205_v45 = vmul.f32 %v420_v2, %v198_v42  ;;  %v196_v52 = vadd.f32 %v195_v47, %v179_v49  ;;  %v235_v57 = vmul.f32 %v422_v53, %v228_v54  ;;  %v373_v42 = vsub.s32 5, %v588_v15 }
 0x114   :  { %v210_v50 = vmul.f32 %v208_v12, %v205_v45  ;;  %v240_v63 = vmul.f32 %v238_v37, %v235_v57 }
 0x115   :  { %v270_v60 = vpop.permute.xlu0 %269 }
 0x116   :  { %v211_v55 = vadd.f32 %v210_v50, %v196_v52  ;;  %v277_v8 = vmul.f32 %v425_v0, %v270_v60 }
 0x118   :  { %v226_v59 = vadd.f32 %v225_v56, %v211_v55  ;;  %v282_v25 = vmul.f32 %v280_v11, %v277_v8 }
 0x119   :  { %v300_v17 = vpop.permute.xlu0 %299 }
 0x11a   :  { %v241_v5 = vadd.f32 %v240_v63, %v226_v59  ;;  %v307_v26 = vmul.f32 %v427_v14, %v300_v17 }
 0x11c   :  { %v253_v19 = vadd.f32 %v252_v7, %v241_v5  ;;  %v312_v32 = vmul.f32 %v310_v38, %v307_v26 }
 0x122   :  { %v320_v61 = vpop.permute.xlu1 %319 }
 0x126   :  { %v255_v6 = vpop.permute.xlu1 %254 }
 0x127   :  { %v262_v13 = vmul.f32 %v424_v4, %v255_v6 }
 0x129   :  { %v267_v20 = vmul.f32 %v265_v35, %v262_v13  ;;  %v363_v35 = vsub.s32 4, %v588_v15 }
 0x12a   :  { %v285_v24 = vpop.permute.xlu1 %284  ;;  %v329_v11 = vpop.permute.xlu0 %328 }
 0x12b   :  { %v268_v27 = vadd.f32 %v267_v20, %v253_v19  ;;  %v292_v28 = vmul.f32 %v426_v18, %v285_v24 }
 0x12d   :  { %v283_v29 = vadd.f32 %v282_v25, %v268_v27  ;;  %v297_v30 = vmul.f32 %v295_v39, %v292_v28 }
 0x12e   :  { %v339_v31 = vpop.permute.xlu1 %338 }
 0x12f   :  { %v298_v33 = vadd.f32 %v297_v30, %v283_v29  ;;  %v359_v43 = vpop.permute.xlu0 %358 }
 0x131   :  { %v313_v1 = vadd.f32 %v312_v32, %v298_v33 }
 0x133   :  { %v314_v3 = vmax.f32 %v313_v1, 0.0  ;;  %v349_v10 = vpop.permute.xlu1 %348 }
 0x134   :  { %v389_v52 = vpop.permute.xlu0 %388 }
 0x135   :  { %v325_v34 = vrot.slane %v314_v3, %v591_v16  ;;  %v334_v9 = vrot.slane %v314_v3, %v609_v22  ;;  %v344_v36 = vrot.slane %v314_v3, %v606_v21  ;;  %v354_v12 = vrot.slane %v314_v3, %v612_v23 }
 0x136   :  { %v364_v2 = vrot.slane %v314_v3, %v363_v35  ;;  %v393_v22 = vsub.s32 7, %v588_v15  ;;  %v383_v21 = vsub.s32 6, %v588_v15  ;;  %v374_v47 = vrot.slane %v314_v3, %v373_v42 }
 0x137   :  { %v326_v37 = vmul.f32 %v325_v34, %v320_v61  ;;  %v335_v40 = vmul.f32 %v334_v9, %v329_v11  ;;  %v345_v38 = vmul.f32 %v344_v36, %v339_v31  ;;  %v355_v16 = vmul.f32 %v354_v12, %v349_v10 }
 0x138   :  { %v369_v39 = vpop.permute.xlu1 %368  ;;  %v365_v45 = vmul.f32 %v364_v2, %v359_v43  ;;  %v394_v49 = vrot.slane %v314_v3, %v393_v22  ;;  %v384_v51 = vrot.slane %v314_v3, %v383_v21 }
 0x139   :  { %v336_v41 = vadd.f32 %v335_v40, %v326_v37  ;;  %v375_v23 = vmul.f32 %v374_v47, %v369_v39 }
 0x13a   :  { %v395_v55 = vmul.f32 %v394_v49, %v389_v52 }
 0x13b   :  { %v346_v44 = vadd.f32 %v345_v38, %v336_v41 }
 0x13d   :  { %v356_v46 = vadd.f32 %v355_v16, %v346_v44  ;;  %v379_v48 = vpop.permute.xlu1 %378 }
 0x13e   :  { %v385_v54 = vmul.f32 %v384_v51, %v379_v48 }
 0x13f   :  { %v366_v50 = vadd.f32 %v365_v45, %v356_v46 }
 0x141   :  { %v376_v53 = vadd.f32 %v375_v23, %v366_v50 }
 0x142   :  { %v400_v57 = vpop.permute.xlu1 %399 }
 0x143   :  { %v386_v56 = vadd.f32 %v385_v54, %v376_v53 }
 0x145   :  { %v396_v58 = vadd.f32 %v395_v55, %v386_v56 }
 0x147   :  { %v402_v59 = vadd.f32 %v400_v57, %v396_v58 }
 0x149   :  { %v403_v60 = vmax.f32 %v402_v59, 0.0 }
 0x14b   :  { %404 = vst [vmem:[#allocation2] sm:$0xff] %v403_v60 }
 0x14c   :  { %480 = shalt.err (!%p477_p4)
}
 0x14d   :  { %s481_s26 = scalar_lea.hbm %s712_s9, 128 }
 0x14e   :  { %p482_p5 = scmp.ne.s32.totalorder %s712_s9, %s481_s26  ;;  %p485_p6 = scmp.lt.u32.totalorder %s481_s26, %s712_s9 }
 0x150   :  { %p487_p7 = pnand %p485_p6, %p482_p5 }
 0x152   :  { %490 = shalt.err (!%p487_p7)
}
 0x153   :  { %414 = dma.vmem_to_hbm [thread:$0]  %s412_s22, 128, %s712_s9, [#allocation3]  }
 0x154   :  { %491 = dma.done.wait [#allocation3], 128  }
 0x155   :  { %492 = vsyncadd [#allocation3], 4294967168 }
 0x156   :  { %418 = vsyncpa [#allocation3], 1 }

</bundles_post_ra>
